<compile_context>
chip_gen: v6e
topology: v6e:2x2x1
jax: 0.10.0
libtpu: 0.0.40
codegen_flags: <defaults>
</compile_context>

<pallas_src>
import functools
import math

import jax
import jax.numpy as jnp
from jax.experimental import pallas as pl
from jax.experimental.pallas import tpu as pltpu


def _round_up(x, m):
    return (x + m - 1) // m * m


# --------------------------------------------------------------------------
# Kernel 1: reparameterization sampling + KL reduction
# --------------------------------------------------------------------------
def _softplus(x):
    # numerically stable softplus (log1p(exp(x)) overflows for large x)
    return jnp.maximum(x, 0.0) + jnp.log1p(jnp.exp(-jnp.abs(x)))


def sample_kl_kernel(mu_w_ref, rho_w_ref, eps_w_ref,
                     mu_b_ref, rho_b_ref, eps_b_ref,
                     w_ref, b_ref, kl_ref,
                     *, prior_mean, prior_sigma):
    """softplus(rho) -> sigma, sample weights/bias, full KL reduction to SMEM."""
    mu_w = mu_w_ref[...]
    sigma_w = _softplus(rho_w_ref[...])
    w_ref[...] = mu_w + sigma_w * eps_w_ref[...]

    mu_b = mu_b_ref[...]
    sigma_b = _softplus(rho_b_ref[...])
    b_ref[...] = mu_b + sigma_b * eps_b_ref[...]

    def kl_elem(mu_q, sigma_q):
        # NOTE: `prior_sigma` is the module's `prior_variance` used directly as a
        # sigma -- this matches the (misnamed) convention of the PyTorch code.
        return (math.log(prior_sigma + 1e-15)
                - jnp.log(sigma_q + 1e-15)
                + (sigma_q * sigma_q + (mu_q - prior_mean) ** 2)
                / (2.0 * prior_sigma * prior_sigma)
                - 0.5)

    kl = jnp.sum(kl_elem(mu_w, sigma_w)) + jnp.sum(kl_elem(mu_b, sigma_b))
    kl_ref[0, 0] = kl


def _full_vmem_spec(shape):
    ndim = len(shape)
    return pl.BlockSpec(shape, lambda: (0,) * ndim)


def sample_weights_and_kl(mu_w, rho_w, eps_w, mu_b, rho_b, eps_b,
                          prior_mean, prior_variance):
    """Weight mu/rho/eps are (O, C*K) 2D; bias ones are (1, O)."""
    # TODO(synk): for very large layers, tile this kernel over O with a grid and
    # accumulate KL in SMEM scratch finalized via pl.when; also generate eps
    # in-kernel with pltpu.prng_seed/stateful_normal to drop 1/3 of the DMA.
    kern = functools.partial(sample_kl_kernel,
                             prior_mean=float(prior_mean),
                             prior_sigma=float(prior_variance))
    w, b, kl = pl.pallas_call(
        kern,
        out_shape=(
            jax.ShapeDtypeStruct(mu_w.shape, jnp.float32),
            jax.ShapeDtypeStruct(mu_b.shape, jnp.float32),
            jax.ShapeDtypeStruct((1, 1), jnp.float32),
        ),
        in_specs=[_full_vmem_spec(mu_w.shape), _full_vmem_spec(rho_w.shape),
                  _full_vmem_spec(eps_w.shape), _full_vmem_spec(mu_b.shape),
                  _full_vmem_spec(rho_b.shape), _full_vmem_spec(eps_b.shape)],
        out_specs=(_full_vmem_spec(mu_w.shape), _full_vmem_spec(mu_b.shape),
                   pl.BlockSpec(memory_space=pltpu.SMEM)),   # scalar KL -> SMEM
    )(mu_w, rho_w, eps_w, mu_b, rho_b, eps_b)
    return w, b, kl[0, 0]


# --------------------------------------------------------------------------
# Kernel 2: conv as tiled MXU matmul (patches @ weight_T + bias)
# --------------------------------------------------------------------------
def conv_matmul_kernel(p_ref, w_ref, b_ref, o_ref, acc_ref):
    k = pl.program_id(2)

    @pl.when(k == 0)
    def _init():
        acc_ref[...] = jnp.zeros_like(acc_ref)

    # plain [TR,TK] @ [TK,TO] -- weight is already transposed in the wrapper, so
    # the contraction is last-dim/first-dim (no in-kernel RHS transpose).
    acc_ref[...] += jnp.dot(p_ref[...], w_ref[...],
                            preferred_element_type=jnp.float32)

    @pl.when(k == pl.num_programs(2) - 1)
    def _finalize():
        o_ref[...] = (acc_ref[...] + b_ref[...]).astype(o_ref.dtype)


# TODO(synk): fuse im2col into the matmul kernel (manual DMA of shifted x
# windows per (n, l_out-tile, k) with memory_space=pl.ANY) to avoid
# materializing the K-times-expanded patches array in HBM; at small channel
# counts this conv is HBM-bound on v5e/v6e.
def im2col_1d(x, kernel_size, stride, padding, dilation, ck_pad):
    """x: (N, C, L) -> patches (N*L_out, ck_pad); column order = (C major, K minor)."""
    N, C, L = x.shape
    L_out = (L + 2 * padding - dilation * (kernel_size - 1) - 1) // stride + 1
    x_pad = jnp.pad(x, ((0, 0), (0, 0), (padding, padding)))
    cols = []
    for k in range(kernel_size):
        start = k * dilation
        stop = start + (L_out - 1) * stride + 1
        cols.append(jax.lax.slice(x_pad, (0, 0, start), (N, C, stop),
                                  (1, 1, stride)))           # (N, C, L_out)
    patches = jnp.stack(cols, axis=-1)                        # (N, C, L_out, K)
    patches = patches.transpose(0, 2, 1, 3).reshape(N * L_out, C * kernel_size)
    ck = C * kernel_size
    if ck_pad > ck:
        patches = jnp.pad(patches, ((0, 0), (0, ck_pad - ck)))
    return patches, L_out


def conv1d_pallas(x, weight2d, bias2d, stride, padding, dilation):
    """x (N, C, L); weight2d (O, C*K); bias2d (1, O)  ->  (N, O, L_out)."""
    N, C, L = x.shape
    O, CK = weight2d.shape
    K = CK // C

    # --- padding / tiling decisions (sized for v7x's 32 MiB scoped VMEM) -----
    if CK <= 2048:
        CK_pad = _round_up(CK, 8)        # single K block; keeps patches HBM
        TK = CK_pad                      # traffic minimal for small C_in*K
    else:
        CK_pad = _round_up(CK, 512)      # tile the contraction dimension
        TK = 512
    O_pad = _round_up(O, 128)            # lane-dense output stores
    TO = 256 if O_pad % 256 == 0 else 128

    patches, L_out = im2col_1d(x, K, stride, padding, dilation, CK_pad)
    R = N * L_out
    TR = min(512, _round_up(R, 8))       # <=512-row tiles: fits v7x scoped VMEM
    R_pad = _round_up(R, TR)
    if R_pad > R:
        patches = jnp.pad(patches, ((0, R_pad - R), (0, 0)))

    # Pre-transpose / zero-pad the weight once in XLA: (CK_pad, O_pad).
    w_t = jnp.zeros((CK_pad, O_pad), weight2d.dtype).at[:CK, :O].set(weight2d.T)
    b_p = jnp.zeros((1, O_pad), bias2d.dtype).at[:, :O].set(bias2d)
    # NOTE: on v6e/v7x, casting `patches`/`w_t` to bf16 here (accumulation stays
    # f32 via preferred_element_type) halves input DMA bytes if accuracy permits.

    grid = (R_pad // TR, O_pad // TO, CK_pad // TK)
    out = pl.pallas_call(
        conv_matmul_kernel,
        out_shape=jax.ShapeDtypeStruct((R_pad, O_pad), x.dtype),
        grid_spec=pltpu.PrefetchScalarGridSpec(
            num_scalar_prefetch=0,
            grid=grid,
            in_specs=[pl.BlockSpec((TR, TK), lambda r, o, k: (r, k)),
                      pl.BlockSpec((TK, TO), lambda r, o, k: (k, o)),
                      pl.BlockSpec((1, TO), lambda r, o, k: (0, o))],
            out_specs=pl.BlockSpec((TR, TO), lambda r, o, k: (r, o)),
            scratch_shapes=[pltpu.VMEM((TR, TO), jnp.float32)]),
        compiler_params=pltpu.CompilerParams(
            dimension_semantics=("parallel", "parallel", "arbitrary")),
    )(patches, w_t, b_p)

    out = out[:R, :O].reshape(N, L_out, O).transpose(0, 2, 1)   # (N, O, L_out)
    return out


# --------------------------------------------------------------------------
# Module wrapper
# --------------------------------------------------------------------------
class Conv1dVariationalPallas:
    """Forward-pass-only JAX/Pallas port of Conv1dVariational (groups=1)."""

    def __init__(self, prior_mean, prior_variance, posterior_mu_init,
                 posterior_rho_init, in_channels, out_channels, kernel_size,
                 stride=1, padding=0, dilation=1, groups=1, bias=True,
                 init_key=None):
        assert groups == 1, "groups != 1 not implemented"
        assert bias, "bias=False path not exercised here"
        if init_key is None:
            init_key = jax.random.PRNGKey(0)
        self.prior_mean = prior_mean
        self.prior_variance = prior_variance
        self.in_channels = in_channels
        self.out_channels = out_channels
        self.kernel_size = kernel_size
        self.stride = stride
        self.padding = padding
        self.dilation = dilation

        k0, k1, k2, k3 = jax.random.split(init_key, 4)
        wshape = (out_channels, in_channels, kernel_size)
        # mu ~ N(0, 0.1), rho ~ N(posterior_rho_init, 0.1)  (matches init_parameters)
        self.mu_kernel = 0.1 * jax.random.normal(k0, wshape, jnp.float32)
        self.rho_kernel = posterior_rho_init + 0.1 * jax.random.normal(
            k1, wshape, jnp.float32)
        self.mu_bias = 0.1 * jax.random.normal(k2, (out_channels,), jnp.float32)
        self.rho_bias = posterior_rho_init + 0.1 * jax.random.normal(
            k3, (out_channels,), jnp.float32)

    def forward(self, x, eps_key):
        N, C, L = x.shape
        O, _, K = self.mu_kernel.shape

        ek, eb = jax.random.split(eps_key)
        eps_kernel = jax.random.normal(ek, self.mu_kernel.shape, jnp.float32)
        eps_bias = jax.random.normal(eb, self.mu_bias.shape, jnp.float32)

        # Flatten to 2D for the sampling kernel (lane dim last).
        mu_w2 = self.mu_kernel.reshape(O, C * K)
        rho_w2 = self.rho_kernel.reshape(O, C * K)
        eps_w2 = eps_kernel.reshape(O, C * K)
        mu_b2 = self.mu_bias.reshape(1, O)
        rho_b2 = self.rho_bias.reshape(1, O)
        eps_b2 = eps_bias.reshape(1, O)

        weight2d, bias2d, kl = sample_weights_and_kl(
            mu_w2, rho_w2, eps_w2, mu_b2, rho_b2, eps_b2,
            self.prior_mean, self.prior_variance)

        out = conv1d_pallas(x, weight2d, bias2d, self.stride, self.padding,
                            self.dilation)
        return out, kl, weight2d.reshape(O, C, K), bias2d.reshape(O)


# --------------------------------------------------------------------------
# References (pure JAX) for sanity checks
# --------------------------------------------------------------------------
def reference_forward(x, weight, bias, stride, padding, dilation):
    out = jax.lax.conv_general_dilated(
        x, weight,
        window_strides=(stride,),
        padding=[(padding, padding)],
        rhs_dilation=(dilation,),
        dimension_numbers=("NCH", "OIH", "NCH"))
    return out + bias[None, :, None]


def reference_kl(mu, rho, prior_mean, prior_sigma):
    sigma_q = jnp.log1p(jnp.exp(rho))
    return jnp.sum(jnp.log(prior_sigma + 1e-15) - jnp.log(sigma_q + 1e-15)
                   + (sigma_q ** 2 + (mu - prior_mean) ** 2)
                   / (2.0 * prior_sigma ** 2) - 0.5)


if __name__ == "__main__":
    # Small, conv1d-consistent shapes: x is (batch=2, in_channels=4, length=16)
    N, C_in, L = 2, 4, 16
    C_out, K = 8, 3
    stride, padding, dilation = 1, 1, 1

    layer = Conv1dVariationalPallas(
        prior_mean=0.0, prior_variance=1.0,
        posterior_mu_init=0.0, posterior_rho_init=-3.0,
        in_channels=C_in, out_channels=C_out, kernel_size=K,
        stride=stride, padding=padding, dilation=dilation,
        init_key=jax.random.PRNGKey(0))

    key = jax.random.PRNGKey(0)
    kx, keps = jax.random.split(key)
    x = jax.random.normal(kx, (N, C_in, L), jnp.float32)

    out, kl, weight, bias = layer.forward(x, keps)
    out = jax.block_until_ready(out)
    kl = jax.block_until_ready(kl)

    # Conv result vs pure-JAX conv using the same sampled weights.
    L_out = (L + 2 * padding - dilation * (K - 1) - 1) // stride + 1
    ref = reference_forward(x, weight, bias, stride, padding, dilation)
    assert out.shape == (N, C_out, L_out)
    assert jnp.allclose(out, ref, atol=1e-4, rtol=1e-4)

    # KL vs pure-JAX reference.
    kl_ref = (reference_kl(layer.mu_kernel, layer.rho_kernel, 0.0, 1.0)
              + reference_kl(layer.mu_bias, layer.rho_bias, 0.0, 1.0))
    assert jnp.isfinite(kl)
    assert jnp.allclose(kl, kl_ref, atol=1e-2, rtol=1e-4)

    print("KERNEL_OK")
</pallas_src>

<mosaic_0001>
module attributes {stable_mosaic.version = 11 : i64} {
  func.func @sample_kl_kernel(%arg0: memref<8x12xf32, #tpu.memory_space<vmem>>, %arg1: memref<8x12xf32, #tpu.memory_space<vmem>>, %arg2: memref<8x12xf32, #tpu.memory_space<vmem>>, %arg3: memref<1x8xf32, #tpu.memory_space<vmem>>, %arg4: memref<1x8xf32, #tpu.memory_space<vmem>>, %arg5: memref<1x8xf32, #tpu.memory_space<vmem>>, %arg6: memref<8x12xf32, #tpu.memory_space<vmem>>, %arg7: memref<1x8xf32, #tpu.memory_space<vmem>>, %arg8: memref<1x1xf32, #tpu.memory_space<smem>>) attributes {dimension_semantics = [], scalar_prefetch = 0 : i64, scratch_operands = 0 : i64, tpu.core_type = #tpu.core_type<tc>} {
    %c0 = arith.constant 0 : index
    %c0_0 = arith.constant 0 : index
    %0 = vector.load %arg0[%c0, %c0_0] : memref<8x12xf32, #tpu.memory_space<vmem>>, vector<8x12xf32>
    %c0_1 = arith.constant 0 : index
    %c0_2 = arith.constant 0 : index
    %1 = vector.load %arg1[%c0_1, %c0_2] : memref<8x12xf32, #tpu.memory_space<vmem>>, vector<8x12xf32>
    %cst = arith.constant 0.000000e+00 : f32
    %2 = vector.broadcast %cst : f32 to vector<8x12xf32>
    %3 = arith.maximumf %1, %2 : vector<8x12xf32>
    %4 = math.absf %1 : vector<8x12xf32>
    %cst_3 = arith.constant 0.000000e+00 : f32
    %5 = vector.broadcast %cst_3 : f32 to vector<8x12xf32>
    %6 = arith.subf %5, %4 : vector<8x12xf32>
    %7 = math.exp %6 : vector<8x12xf32>
    %8 = math.log1p %7 : vector<8x12xf32>
    %9 = arith.addf %3, %8 : vector<8x12xf32>
    %c0_4 = arith.constant 0 : index
    %c0_5 = arith.constant 0 : index
    %10 = vector.load %arg2[%c0_4, %c0_5] : memref<8x12xf32, #tpu.memory_space<vmem>>, vector<8x12xf32>
    %11 = arith.mulf %9, %10 : vector<8x12xf32>
    %12 = arith.addf %0, %11 : vector<8x12xf32>
    %c0_6 = arith.constant 0 : index
    %c0_7 = arith.constant 0 : index
    %13 = vector.load %arg6[%c0_6, %c0_7] : memref<8x12xf32, #tpu.memory_space<vmem>>, vector<8x12xf32>
    tpu.vector_store %arg6[%c0_6, %c0_7], %12 {strides = array<i32>} : memref<8x12xf32, #tpu.memory_space<vmem>>, vector<8x12xf32>,
    %c0_8 = arith.constant 0 : index
    %c0_9 = arith.constant 0 : index
    %14 = vector.load %arg3[%c0_8, %c0_9] : memref<1x8xf32, #tpu.memory_space<vmem>>, vector<1x8xf32>
    %c0_10 = arith.constant 0 : index
    %c0_11 = arith.constant 0 : index
    %15 = vector.load %arg4[%c0_10, %c0_11] : memref<1x8xf32, #tpu.memory_space<vmem>>, vector<1x8xf32>
    %cst_12 = arith.constant 0.000000e+00 : f32
    %16 = vector.broadcast %cst_12 : f32 to vector<1x8xf32>
    %17 = arith.maximumf %15, %16 : vector<1x8xf32>
    %18 = math.absf %15 : vector<1x8xf32>
    %cst_13 = arith.constant 0.000000e+00 : f32
    %19 = vector.broadcast %cst_13 : f32 to vector<1x8xf32>
    %20 = arith.subf %19, %18 : vector<1x8xf32>
    %21 = math.exp %20 : vector<1x8xf32>
    %22 = math.log1p %21 : vector<1x8xf32>
    %23 = arith.addf %17, %22 : vector<1x8xf32>
    %c0_14 = arith.constant 0 : index
    %c0_15 = arith.constant 0 : index
    %24 = vector.load %arg5[%c0_14, %c0_15] : memref<1x8xf32, #tpu.memory_space<vmem>>, vector<1x8xf32>
    %25 = arith.mulf %23, %24 : vector<1x8xf32>
    %26 = arith.addf %14, %25 : vector<1x8xf32>
    %c0_16 = arith.constant 0 : index
    %c0_17 = arith.constant 0 : index
    %27 = vector.load %arg7[%c0_16, %c0_17] : memref<1x8xf32, #tpu.memory_space<vmem>>, vector<1x8xf32>
    tpu.vector_store %arg7[%c0_16, %c0_17], %26 {strides = array<i32>} : memref<1x8xf32, #tpu.memory_space<vmem>>, vector<1x8xf32>,
    %cst_18 = arith.constant 1.000000e-15 : f32
    %28 = vector.broadcast %cst_18 : f32 to vector<8x12xf32>
    %29 = arith.addf %9, %28 : vector<8x12xf32>
    %30 = math.log %29 : vector<8x12xf32>
    %cst_19 = arith.constant 1.11022302E-15 : f32
    %31 = vector.broadcast %cst_19 : f32 to vector<8x12xf32>
    %32 = arith.subf %31, %30 : vector<8x12xf32>
    %33 = arith.mulf %9, %9 : vector<8x12xf32>
    %cst_20 = arith.constant 0.000000e+00 : f32
    %34 = vector.broadcast %cst_20 : f32 to vector<8x12xf32>
    %35 = arith.subf %0, %34 : vector<8x12xf32>
    %36 = arith.mulf %35, %35 : vector<8x12xf32>
    %37 = arith.addf %33, %36 : vector<8x12xf32>
    %cst_21 = arith.constant 2.000000e+00 : f32
    %38 = vector.broadcast %cst_21 : f32 to vector<8x12xf32>
    %39 = arith.divf %37, %38 : vector<8x12xf32>
    %40 = arith.addf %32, %39 : vector<8x12xf32>
    %cst_22 = arith.constant 5.000000e-01 : f32
    %41 = vector.broadcast %cst_22 : f32 to vector<8x12xf32>
    %42 = arith.subf %40, %41 : vector<8x12xf32>
    %43 = vector.shape_cast %42 : vector<8x12xf32> to vector<1x8x12xf32>
    %cst_23 = arith.constant dense<0.000000e+00> : vector<1xf32>
    %44 = vector.multi_reduction <add>, %43, %cst_23 [1, 2] : vector<1x8x12xf32> to vector<1xf32>
    %45 = vector.shape_cast %44 : vector<1xf32> to vector<1x1x1xf32>
    %46 = vector.extract %45[0, 0, 0] : f32 from vector<1x1x1xf32>
    %cst_24 = arith.constant 1.000000e-15 : f32
    %47 = vector.broadcast %cst_24 : f32 to vector<1x8xf32>
    %48 = arith.addf %23, %47 : vector<1x8xf32>
    %49 = math.log %48 : vector<1x8xf32>
    %cst_25 = arith.constant 1.11022302E-15 : f32
    %50 = vector.broadcast %cst_25 : f32 to vector<1x8xf32>
    %51 = arith.subf %50, %49 : vector<1x8xf32>
    %52 = arith.mulf %23, %23 : vector<1x8xf32>
    %cst_26 = arith.constant 0.000000e+00 : f32
    %53 = vector.broadcast %cst_26 : f32 to vector<1x8xf32>
    %54 = arith.subf %14, %53 : vector<1x8xf32>
    %55 = arith.mulf %54, %54 : vector<1x8xf32>
    %56 = arith.addf %52, %55 : vector<1x8xf32>
    %cst_27 = arith.constant 2.000000e+00 : f32
    %57 = vector.broadcast %cst_27 : f32 to vector<1x8xf32>
    %58 = arith.divf %56, %57 : vector<1x8xf32>
    %59 = arith.addf %51, %58 : vector<1x8xf32>
    %cst_28 = arith.constant 5.000000e-01 : f32
    %60 = vector.broadcast %cst_28 : f32 to vector<1x8xf32>
    %61 = arith.subf %59, %60 : vector<1x8xf32>
    %62 = vector.shape_cast %61 : vector<1x8xf32> to vector<1x1x8xf32>
    %cst_29 = arith.constant dense<0.000000e+00> : vector<1xf32>
    %63 = vector.multi_reduction <add>, %62, %cst_29 [1, 2] : vector<1x1x8xf32> to vector<1xf32>
    %64 = vector.shape_cast %63 : vector<1xf32> to vector<1x1x1xf32>
    %65 = vector.extract %64[0, 0, 0] : f32 from vector<1x1x1xf32>
    %66 = arith.addf %46, %65 : f32
    %c0_30 = arith.constant 0 : index
    %c0_31 = arith.constant 0 : index
    %67 = memref.load %arg8[%c0_30, %c0_31] : memref<1x1xf32, #tpu.memory_space<smem>>
    memref.store %66, %arg8[%c0_30, %c0_31] : memref<1x1xf32, #tpu.memory_space<smem>>
    return
  }
}

</mosaic_0001>

<bundles_post_ra>
// kernel: tpu_custom_call.1
= control target key start
LH: loop header
LB: loop body
LE: loop exit
PB: predicated region body
PF: predicated region fallthrough
CT: control target
= control target key end

     0   :  { %14 = vsyncpa [#allocation3], 0  ;;  %s419_s0 = inlined_call_operand.hbm [shape: f32[8,12], index: 0, kind: input, shape index: {}]   ;;  %s420_s1 = inlined_call_operand.hbm [shape: f32[8,12], index: 1, kind: input, shape index: {}]   ;;  %s421_s2 = inlined_call_operand.hbm [shape: f32[8,12], index: 2, kind: input, shape index: {}]   ;;  %s422_s3 = inlined_call_operand.vmem [shape: f32[1,8], index: 3, kind: input, shape index: {}]   ;;  %s423_s4 = inlined_call_operand.vmem [shape: f32[1,8], index: 4, kind: input, shape index: {}]   ;;  %s424_s5 = inlined_call_operand.vmem [shape: f32[1,8], index: 5, kind: input, shape index: {}]   ;;  %s425_s6 = inlined_call_operand.hbm [shape: f32[8,12], index: 6, kind: output, shape index: {0}]   ;;  %s426_s7 = inlined_call_operand.hbm [shape: f32[1,8], index: 7, kind: output, shape index: {1}]   ;;  %s427_s8 = inlined_call_operand.hbm [shape: f32[1,1], index: 8, kind: output, shape index: {2}]  }
   0x1   :  { %15 = vsyncpa [#allocation7], 0 }
   0x2   :  { %16 = vsyncpa [#allocation4], 0 }
   0x3   :  { %17 = vsyncpa [#allocation11], 0 }
   0x4   :  { %18 = vsyncpa [#allocation5], 0  ;;  %s337_s27 = smov [#allocation6]   ;;  %s338_s29 = smov [#allocation2]  }
   0x5   :  { %s35_s28 = sshll.u32 %s337_s27, 4  ;;  %s25_s30 = sshll.u32 %s338_s29, 4  ;;  %s36_s28 = int_to_ptr.vmem [resolvable:$true] %s35_s28  ;;  %s26_s30 = int_to_ptr.vmem [resolvable:$true] %s25_s30 }
   0x6   :  { %s227_s9 = scalar_lea.vmem %s36_s28, 128  ;;  %p232_p1 = scmp.lt.s32.totalorder %s36_s28, %s36_s28 }
   0x7   :  { %p228_p0 = scmp.ne.s32.totalorder %s36_s28, %s227_s9  ;;  %p233_p2 = scmp.lt.s32.totalorder %s227_s9, %s227_s9 }
   0x9   :  { %p234_p3 = por %p233_p2, %p232_p1 }
   0xb   :  { %p235_p4 = pnand %p234_p3, %p228_p0 }
   0xd   :  { %238 = shalt.err (!%p235_p4)
}
   0xe   :  { %38 = dma.hbm_to_vmem [thread:$0]  %s420_s1, 128, %s36_s28, [#allocation7]  }
   0xf   :  { %s247_s12 = scalar_lea.vmem %s26_s30, 128  ;;  %p252_p6 = scmp.lt.s32.totalorder %s26_s30, %s26_s30 }
  0x10   :  { %p248_p5 = scmp.ne.s32.totalorder %s26_s30, %s247_s12  ;;  %p253_p7 = scmp.lt.s32.totalorder %s247_s12, %s247_s12 }
  0x12   :  { %p254_p8 = por %p253_p7, %p252_p6 }
  0x14   :  { %p255_p9 = pnand %p254_p8, %p248_p5 }
  0x16   :  { %258 = shalt.err (!%p255_p9)
}
  0x17   :  { %28 = dma.hbm_to_vmem [thread:$0]  %s419_s0, 128, %s26_s30, [#allocation3]  }
  0x18   :  { %s339_s15 = smov [#allocation8]  }
  0x19   :  { %s45_s16 = sshll.u32 %s339_s15, 4  ;;  %s46_s16 = int_to_ptr.vmem [resolvable:$true] %s45_s16 }
  0x1a   :  { %s267_s17 = scalar_lea.vmem %s46_s16, 128  ;;  %p272_p11 = scmp.lt.s32.totalorder %s46_s16, %s46_s16 }
  0x1b   :  { %p268_p10 = scmp.ne.s32.totalorder %s46_s16, %s267_s17  ;;  %p273_p12 = scmp.lt.s32.totalorder %s267_s17, %s267_s17 }
  0x1d   :  { %p274_p13 = por %p273_p12, %p272_p11 }
  0x1f   :  { %p275_p0 = pnand %p274_p13, %p268_p10 }
  0x21   :  { %278 = shalt.err (!%p275_p0)
}
  0x22   :  { %48 = dma.hbm_to_vmem [thread:$0]  %s421_s2, 128, %s46_s16, [#allocation7]  }
  0x23   :  { %327 = dma.done.wait [#allocation3], 128  }
  0x24   :  { %328 = vsyncadd [#allocation3], 4294967168 }
  0x25   :  { %329 = dma.done.wait [#allocation7], 256  }
  0x26   :  { %330 = vsyncadd [#allocation7], 4294967040  ;;  %v65_v0 = vld [vmem:[#allocation6] sm:$0xff]  ;;  %v87_v2 = vld [vmem:[%s423_s4] sm:$0x1]  ;;  %vm84_vm2 = vcmask 97280  }
  0x27   :  { %v67_v1 = vand.u32 2147483647, %v65_v0  ;;  %v89_v3 = vand.u32 2147483647, %v87_v2  ;;  %v66_v20 = vmax.f32 %v65_v0, 0.0  ;;  %v88_v24 = vmax.f32 %v87_v2, 0.0 }
  0x28   :  { %v64_v32 = vld [vmem:[#allocation2] sm:$0xff]  ;;  %vm106_vm3 = vcmask 57344   ;;  %v81_v54 = vld [vmem:[#allocation8] sm:$0xff]  ;;  %s340_s21 = smov [#allocation9]   ;;  %s341_s23 = smov [#allocation10]  }
  0x29   :  { %v68_v4 = vsub.f32 0.0, %v67_v1  ;;  %v90_v5 = vsub.f32 0.0, %v89_v3  ;;  %v86_v33 = vld [vmem:[%s422_s3] sm:$0x1]  ;;  %v113_v35 = vmul.f32 %v64_v32, %v64_v32  ;;  %s158_s22 = sshll.u32 %s340_s21, 4  ;;  %s168_s24 = sshll.u32 %s341_s23, 4  ;;  %s159_s22 = int_to_ptr.vmem [resolvable:$true] %s158_s22  ;;  %s169_s24 = int_to_ptr.vmem [resolvable:$true] %s168_s24 }
  0x2a   :  { %v134_v37 = vmul.f32 %v86_v33, %v86_v33  ;;  %v103_v55 = vld [vmem:[%s424_s5] sm:$0x1]  ;;  %s279_s25 = scalar_lea.vmem %s159_s22, 128  ;;  %p284_p2 = scmp.lt.s32.totalorder %s159_s22, %s159_s22 }
  0x2b   :  { %v69_v6 = vmul.f32 1.442695, %v68_v4  ;;  %v91_v7 = vmul.f32 1.442695, %v90_v5  ;;  %p280_p1 = scmp.ne.s32.totalorder %s159_s22, %s279_s25  ;;  %p285_p3 = scmp.lt.s32.totalorder %s279_s25, %s279_s25 }
  0x2d   :  { %207 = vpow2.f32 %v69_v6  ;;  %p286_p4 = por %p285_p3, %p284_p2 }
  0x2e   :  { %209 = vpow2.f32 %v91_v7 }
  0x2f   :  { %p287_p5 = pnand %p286_p4, %p280_p1 }
  0x3a   :  { %v208_v8 = vpop.eup %207 }
  0x3b   :  { %v210_v9 = vpop.eup %209  ;;  %v71_v10 = vadd.f32 1.0, %v208_v8  ;;  %v74_v12 = vmul.f32 -0.5, %v208_v8  ;;  %v77_v15 = vand.u32 2147483647, %v208_v8 }
  0x3c   :  { %v93_v11 = vadd.f32 1.0, %v210_v9  ;;  %v96_v13 = vmul.f32 -0.5, %v210_v9  ;;  %v99_v17 = vand.u32 2147483647, %v210_v9 }
  0x3d   :  { %211 = vlog2.f32 %v71_v10  ;;  %v75_v14 = vadd.f32 1.0, %v74_v12  ;;  %vm78_vm0 = vcmp.lt.f32.partialorder %v77_v15, 0.0004427343 }
  0x3e   :  { %213 = vlog2.f32 %v93_v11  ;;  %v97_v16 = vadd.f32 1.0, %v96_v13  ;;  %vm100_vm1 = vcmp.lt.f32.partialorder %v99_v17, 0.0004427343 }
  0x3f   :  { %v76_v18 = vmul.f32 %v208_v8, %v75_v14 }
  0x40   :  { %v98_v21 = vmul.f32 %v210_v9, %v97_v16 }
  0x4a   :  { %v212_v19 = vpop.eup %211 }
  0x4b   :  { %v214_v22 = vpop.eup %213  ;;  %v73_v23 = vmul.f32 0.6931472, %v212_v19 }
  0x4c   :  { %v95_v25 = vmul.f32 0.6931472, %v214_v22 }
  0x4d   :  { %v79_v26 = vsel %vm78_vm0, %v76_v18, %v73_v23 }
  0x4e   :  { %v80_v27 = vadd.f32 %v79_v26, %v66_v20  ;;  %v101_v28 = vsel %vm100_vm1, %v98_v21, %v95_v25 }
  0x4f   :  { %v102_v29 = vadd.f32 %v101_v28, %v88_v24 }
  0x50   :  { %v108_v30 = vadd.f32 1e-15, %v80_v27  ;;  %v112_v34 = vmul.f32 %v80_v27, %v80_v27  ;;  %v82_v56 = vmul.f32 %v81_v54, %v80_v27 }
  0x51   :  { %v129_v31 = vadd.f32 1e-15, %v102_v29  ;;  %v133_v36 = vmul.f32 %v102_v29, %v102_v29  ;;  %v104_v57 = vmul.f32 %v103_v55, %v102_v29 }
  0x52   :  { %215 = vlog2.f32 %v108_v30  ;;  %v114_v38 = vadd.f32 %v113_v35, %v112_v34  ;;  %v83_v58 = vadd.f32 %v82_v56, %v64_v32 }
  0x53   :  { %217 = vlog2.f32 %v129_v31  ;;  %v135_v39 = vadd.f32 %v134_v37, %v133_v36  ;;  %v105_v59 = vadd.f32 %v104_v57, %v86_v33 }
  0x54   :  { %v116_v43 = vmul.f32 0.5, %v114_v38  ;;  %85 = vst.msk [vmem:[#allocation9] sm:$0xff] %vm84_vm2, %v83_v58 }
  0x55   :  { %v136_v45 = vmul.f32 0.5, %v135_v39  ;;  %107 = vst.msk [vmem:[#allocation10] sm:$0x1] %vm106_vm3, %v105_v59 }
  0x5f   :  { %v216_v40 = vpop.eup %215 }
  0x60   :  { %v218_v41 = vpop.eup %217  ;;  %v110_v42 = vmul.f32 0.6931472, %v216_v40 }
  0x61   :  { %v131_v44 = vmul.f32 0.6931472, %v218_v41 }
  0x62   :  { %v111_v46 = vsub.f32 1.110223e-15, %v110_v42 }
  0x63   :  { %v132_v47 = vsub.f32 1.110223e-15, %v131_v44 }
  0x64   :  { %v117_v48 = vadd.f32 %v116_v43, %v111_v46 }
  0x65   :  { %v137_v49 = vadd.f32 %v136_v45, %v132_v47 }
  0x66   :  { %v195_v50 = vadd.f32 -0.5, %v117_v48 }
  0x67   :  { %v196_v51 = vadd.f32 -0.5, %v137_v49 }
  0x68   :  { %v119_v52 = vsel %vm84_vm2, %v195_v50, 0.0 }
  0x69   :  { %120 = vadd.xlane.f32.xlu0 %v119_v52  ;;  %v139_v53 = vsel %vm106_vm3, %v196_v51, 0.0 }
  0x6d   :  { %140 = vadd.xlane.f32.xlu0 %v139_v53 }
  0x6e   :  { %290 = shalt.err (!%p287_p5)
}
  0x6f   :  { %161 = dma.vmem_to_hbm [thread:$0]  %s159_s22, 128, %s425_s6, [#allocation4]  }
  0x70   :  { %s299_s27 = scalar_lea.vmem %s169_s24, 16  ;;  %s303_s28 = scalar_lea.vmem %s169_s24, 32 }
  0x71   :  { %p300_p6 = scmp.ne.s32.totalorder %s169_s24, %s299_s27  ;;  %p304_p7 = scmp.lt.s32.totalorder %s169_s24, %s169_s24 }
  0x72   :  { %p305_p8 = scmp.lt.s32.totalorder %s303_s28, %s299_s27 }
  0x74   :  { %p306_p9 = por %p305_p8, %p304_p7 }
  0x76   :  { %p307_p10 = pnand %p306_p9, %p300_p6 }
  0x78   :  { %310 = shalt.err (!%p307_p10)
}
  0x79   :  { %171 = dma.vmem_to_hbm [thread:$0]  %s169_s24, 16, %s426_s7, [#allocation11]  }
  0x7a   :  { %s342_s7 = smov [#allocation12]  }
  0xf2   :  { %v121_v60 = vpop.xlane.xlu0 %120 }
  0xf3   :  { %v122_v61 = vrot.slane %v121_v60, 4 }
  0xf5   :  { %v123_v62 = vadd.f32 %v122_v61, %v121_v60 }
  0xf6   :  { %v141_v63 = vpop.xlane.xlu0 %140 }
  0xf7   :  { %v124_v0 = vrot.slane %v123_v62, 2  ;;  %v142_v1 = vrot.slane %v141_v63, 4 }
  0xf9   :  { %v143_v2 = vadd.f32 %v142_v1, %v141_v63  ;;  %v125_v3 = vadd.f32 %v124_v0, %v123_v62 }
  0xfb   :  { %v144_v4 = vrot.slane %v143_v2, 2  ;;  %v126_v5 = vrot.slane %v125_v3, 1 }
  0xfd   :  { %v145_v6 = vadd.f32 %v144_v4, %v143_v2  ;;  %v127_v7 = vadd.f32 %v126_v5, %v125_v3 }
  0xff   :  { %197 = vpush %v127_v7  ;;  %v146_v8 = vrot.slane %v145_v6, 1 }
 0x101   :  { %v147_v9 = vadd.f32 %v146_v8, %v145_v6 }
 0x103   :  { %199 = vpush %v147_v9 }
 0x130   :  { %s198_s6 = spop %197 }
 0x134   :  { %s200_s9 = spop %199 }
 0x135   :  { %s149_s10 = sadd.f32 %s200_s9, %s198_s6 }
 0x137   :  { %151 = sst [smem:[#allocation12]] %s149_s10 }
 0x138   :  { %179 = dma.smem_to_hbm %s342_s7, 16, %s427_s8, [#allocation5]  }
 0x139   :  { %331 = dma.done.wait [#allocation4], 128  }
 0x13a   :  { %332 = vsyncadd [#allocation4], 4294967168 }
 0x13b   :  { %333 = dma.done.wait [#allocation11], 16  }
 0x13c   :  { %334 = vsyncadd [#allocation11], 4294967280 }
 0x13d   :  { %335 = dma.done.wait [#allocation5], 16  }
 0x13e   :  { %336 = vsyncadd [#allocation5], 4294967280 }
 0x13f   :  { %189 = sfence }
 0x140   :  { %190 = vsyncpa [#allocation3], 1 }
 0x141   :  { %191 = vsyncpa [#allocation7], 1 }
 0x142   :  { %192 = vsyncpa [#allocation4], 1 }
 0x143   :  { %193 = vsyncpa [#allocation11], 1 }
 0x144   :  { %194 = vsyncpa [#allocation5], 1 }

</bundles_post_ra>
